<compile_context>
chip_gen: v6e
topology: v6e:2x2x1
jax: 0.10.0
libtpu: 0.0.40
codegen_flags: <defaults>
</compile_context>

<pallas_src>
import functools

import jax
import jax.numpy as jnp
from jax import lax
from jax.experimental import pallas as pl
from jax.experimental.pallas import tpu as pltpu


def _conv_gemm_kernel(p_ref, w_ref, y_ref, sum_ref, ssq_ref):
    """One fused GEMM per (batch, row-tile): y[Cout, rows] = w[Cout, KKC] @ p[KKC, rows].
    Also emits per-block partial channel sums / sums-of-squares for BatchNorm."""
    y = jnp.dot(w_ref[...], p_ref[0],                        # bf16 x bf16 -> f32 acc
                preferred_element_type=jnp.float32)           # [Cout, rows]
    y_ref[0] = y.astype(y_ref.dtype)                          # lane-dense bf16 store
    sum_ref[0] = jnp.sum(y, axis=1, keepdims=True)            # [Cout, 1]  (XLU reduce)
    ssq_ref[0] = jnp.sum(y * y, axis=1, keepdims=True)        # [Cout, 1]


def _bn_relu_kernel(y_ref, scale_ref, shift_ref, o_ref):
    """Fused BatchNorm3d (precomputed scale/shift) + ReLU.  Pure lane-dense affine."""
    y = y_ref[0].astype(jnp.float32)                          # [Cout, rows]
    o_ref[0] = jnp.maximum(y * scale_ref[...] + shift_ref[...], 0.0).astype(o_ref.dtype)


def _pick_row_tile(dhw):
    for t in (1024, 512, 256, 128):
        if dhw % t == 0:
            return t
    return dhw  # full-extent fallback (still a legal block: equals the array dim)


def conv3d_block(x_ncdhw, w_oidhw, bias, gamma, beta, *, eps=1e-5):
    """Equivalent of Conv3DBlock.forward for a freshly-constructed (training-mode) module.

    `bias` is accepted for API parity but intentionally unused: a per-channel constant
    added before training-mode BatchNorm is exactly cancelled by the mean subtraction
    (variance unchanged), so dropping it is numerically exact.
    """
    del bias
    N, Cin, D, H, W = x_ncdhw.shape
    Cout, _, K, _, _ = w_oidhw.shape
    p = (K - 1) // 2
    DHW = D * H * W
    KKC = K * K * K * Cin
    KKC_pad = ((KKC + 127) // 128) * 128                 # lane-align the contraction
    row_tile = _pick_row_tile(DHW)
    R = DHW // row_tile
    NBLK = N * R

    # ---- JAX glue: im2col (in bf16) in channels-first order -> [N, K^3*Cin, D*H*W] ----
    xb = x_ncdhw.astype(jnp.bfloat16)
    xp = jnp.pad(xb, ((0, 0), (0, 0), (p, p), (p, p), (p, p)))
    taps = []
    for kd in range(K):
        for kh in range(K):
            for kw in range(K):
                taps.append(lax.slice(xp, (0, 0, kd, kh, kw),
                                      (N, Cin, kd + D, kh + H, kw + W)))
    patches = jnp.stack(taps, axis=1).reshape(N, KKC, DHW)           # [N, KKC, DHW]
    patches = jnp.pad(patches, ((0, 0), (0, KKC_pad - KKC), (0, 0)))

    # weights [Cout, Cin, K, K, K] -> [Cout, (kd,kh,kw,Cin)], matching the patch order
    w2 = jnp.transpose(w_oidhw, (0, 2, 3, 4, 1)).reshape(Cout, KKC)
    w2 = jnp.pad(w2, ((0, 0), (0, KKC_pad - KKC))).astype(jnp.bfloat16)

    stats_map = lambda n, r: (n * R + r, 0, 0)

    # ---- Pallas kernel 1: fused conv GEMM (bf16 MXU) + BN partial statistics ----
    conv_call = pl.pallas_call(
        _conv_gemm_kernel,
        out_shape=(
            jax.ShapeDtypeStruct((N, Cout, DHW), jnp.bfloat16),      # y (lane-dense)
            jax.ShapeDtypeStruct((NBLK, Cout, 1), jnp.float32),      # partial sums
            jax.ShapeDtypeStruct((NBLK, Cout, 1), jnp.float32),      # partial sums of squares
        ),
        grid=(N, R),
        in_specs=[
            pl.BlockSpec((1, KKC_pad, row_tile), lambda n, r: (n, 0, r)),
            pl.BlockSpec((Cout, KKC_pad), lambda n, r: (0, 0)),
        ],
        out_specs=(
            pl.BlockSpec((1, Cout, row_tile), lambda n, r: (n, 0, r)),
            pl.BlockSpec((1, Cout, 1), stats_map),
            pl.BlockSpec((1, Cout, 1), stats_map),
        ),
        compiler_params=pltpu.CompilerParams(
            dimension_semantics=("parallel", "parallel"),
            vmem_limit_bytes=48 * 1024 * 1024),
    )
    y, s_part, ssq_part = conv_call(patches, w2)

    # ---- tiny JAX glue: reduce partials (N*R x Cout values), fold BN into scale/shift ----
    count = float(N * DHW)
    s_tot = jnp.sum(s_part, axis=0)                                   # [Cout, 1]
    ssq_tot = jnp.sum(ssq_part, axis=0)                               # [Cout, 1]
    mean = s_tot / count
    var = ssq_tot / count - mean * mean                               # biased batch variance
    g2 = gamma.reshape(Cout, 1).astype(jnp.float32)
    b2 = beta.reshape(Cout, 1).astype(jnp.float32)
    scale = g2 * lax.rsqrt(var + eps)                                 # [Cout, 1]
    shift = b2 - mean * scale                                         # [Cout, 1]

    # ---- Pallas kernel 2: fused BatchNorm3d + ReLU (elementwise, fully parallel) ----
    bn_call = pl.pallas_call(
        _bn_relu_kernel,
        out_shape=jax.ShapeDtypeStruct((N, Cout, DHW), jnp.float32),
        grid=(N, R),
        in_specs=[
            pl.BlockSpec((1, Cout, row_tile), lambda n, r: (n, 0, r)),
            pl.BlockSpec((Cout, 1), lambda n, r: (0, 0)),
            pl.BlockSpec((Cout, 1), lambda n, r: (0, 0)),
        ],
        out_specs=pl.BlockSpec((1, Cout, row_tile), lambda n, r: (n, 0, r)),
        compiler_params=pltpu.CompilerParams(
            dimension_semantics=("parallel", "parallel")),
    )
    out = bn_call(y, scale, shift)

    # Already channels-first: [N, Cout, DHW] -> NCDHW is just a reshape.
    return out.reshape(N, Cout, D, H, W)


def reference(x, w, b, gamma, beta, *, eps=1e-5):
    """Pure-JAX reference matching PyTorch Conv3d + BatchNorm3d(train) + ReLU."""
    K = w.shape[-1]
    p = (K - 1) // 2
    y = lax.conv_general_dilated(
        x, w, window_strides=(1, 1, 1), padding=[(p, p)] * 3,
        dimension_numbers=("NCDHW", "OIDHW", "NCDHW"),
        precision=lax.Precision.HIGHEST)
    y = y + b.reshape(1, -1, 1, 1, 1)
    mean = jnp.mean(y, axis=(0, 2, 3, 4), keepdims=True)
    var = jnp.mean((y - mean) ** 2, axis=(0, 2, 3, 4), keepdims=True)
    yn = (y - mean) * lax.rsqrt(var + eps)
    yn = yn * gamma.reshape(1, -1, 1, 1, 1) + beta.reshape(1, -1, 1, 1, 1)
    return jnp.maximum(yn, 0.0)


if __name__ == "__main__":
    N, Cin, Cout, D, H, W, K = 2, 4, 8, 8, 8, 8, 3

    key = jax.random.PRNGKey(0)
    k1, k2, k3, k4, k5 = jax.random.split(key, 5)
    x = jax.random.normal(k1, (N, Cin, D, H, W), jnp.float32)
    w = 0.1 * jax.random.normal(k2, (Cout, Cin, K, K, K), jnp.float32)  # Conv3d.weight
    b = 0.1 * jax.random.normal(k3, (Cout,), jnp.float32)               # Conv3d.bias
    gamma = 1.0 + 0.1 * jax.random.normal(k4, (Cout,), jnp.float32)     # BN weight
    beta = 0.1 * jax.random.normal(k5, (Cout,), jnp.float32)            # BN bias

    out = conv3d_block(x, w, b, gamma, beta)
    out = jax.block_until_ready(out)

    ref = reference(x, w, b, gamma, beta)
    assert out.shape == (N, Cout, D, H, W)
    max_err = float(jnp.max(jnp.abs(out - ref)))
    # Tolerance loosened vs the fp32-HIGHEST reference because the MXU path and the
    # intermediate activation are bf16.
    assert max_err < 5e-2, f"max abs err = {max_err}"
    print("KERNEL_OK")
</pallas_src>

<mosaic_0001>
module attributes {stable_mosaic.version = 11 : i64} {
  func.func @_conv_gemm_kernel(%arg0: i32, %arg1: i32, %arg2: memref<1x128x512xbf16, #tpu.memory_space<vmem>>, %arg3: memref<8x128xbf16, #tpu.memory_space<vmem>>, %arg4: memref<1x8x512xbf16, #tpu.memory_space<vmem>>, %arg5: memref<1x8x1xf32, #tpu.memory_space<vmem>>, %arg6: memref<1x8x1xf32, #tpu.memory_space<vmem>>) attributes {dimension_semantics = [#tpu.dimension_semantics<parallel>, #tpu.dimension_semantics<parallel>], iteration_bounds = array<i64: 2, 1>, scalar_prefetch = 0 : i64, scratch_operands = 0 : i64, tpu.core_type = #tpu.core_type<tc>, window_params = [{transform_indices = @transform_0, window_bounds = array<i64: 1, 128, 512>}, {pipeline_mode = #tpu.pipeline_mode<synchronous>, transform_indices = @transform_1, window_bounds = array<i64: 8, 128>}, {transform_indices = @transform_2, window_bounds = array<i64: 1, 8, 512>}, {transform_indices = @transform_3, window_bounds = array<i64: 1, 8, 1>}, {transform_indices = @transform_4, window_bounds = array<i64: 1, 8, 1>}]} {
    %c0 = arith.constant 0 : index
    %c0_0 = arith.constant 0 : index
    %0 = vector.load %arg3[%c0, %c0_0] : memref<8x128xbf16, #tpu.memory_space<vmem>>, vector<8x128xbf16>
    %c0_1 = arith.constant 0 : index
    %c0_2 = arith.constant 0 : index
    %c0_3 = arith.constant 0 : index
    %1 = vector.load %arg2[%c0_1, %c0_2, %c0_3] : memref<1x128x512xbf16, #tpu.memory_space<vmem>>, vector<1x128x512xbf16>
    %2 = vector.shape_cast %1 : vector<1x128x512xbf16> to vector<128x512xbf16>
    %cst = arith.constant dense<0.000000e+00> : vector<8x512xf32>
    %3 = tpu.matmul %0, %2, %cst {dimension_numbers = #tpu.dot_dimension_numbers<[1], [0], [0], [1], [0, 0, 1, 1], [], []>} : vector<8x128xbf16>, vector<128x512xbf16>, vector<8x512xf32> -> vector<8x512xf32>
    %4 = arith.truncf %3 : vector<8x512xf32> to vector<8x512xbf16>
    %c0_4 = arith.constant 0 : index
    %c0_5 = arith.constant 0 : index
    %c0_6 = arith.constant 0 : index
    %5 = vector.load %arg4[%c0_4, %c0_5, %c0_6] : memref<1x8x512xbf16, #tpu.memory_space<vmem>>, vector<1x8x512xbf16>
    %6 = vector.shape_cast %5 : vector<1x8x512xbf16> to vector<8x512xbf16>
    %7 = vector.shape_cast %4 : vector<8x512xbf16> to vector<1x8x512xbf16>
    tpu.vector_store %arg4[%c0_4, %c0_5, %c0_6], %7 {strides = array<i32>} : memref<1x8x512xbf16, #tpu.memory_space<vmem>>, vector<1x8x512xbf16>,
    %cst_7 = arith.constant dense<0.000000e+00> : vector<8xf32>
    %8 = vector.multi_reduction <add>, %3, %cst_7 [1] : vector<8x512xf32> to vector<8xf32>
    %9 = vector.shape_cast %8 : vector<8xf32> to vector<8x1xf32>
    %c0_8 = arith.constant 0 : index
    %c0_9 = arith.constant 0 : index
    %c0_10 = arith.constant 0 : index
    %10 = vector.load %arg5[%c0_8, %c0_9, %c0_10] : memref<1x8x1xf32, #tpu.memory_space<vmem>>, vector<1x8x1xf32>
    %11 = vector.shape_cast %10 : vector<1x8x1xf32> to vector<8x1xf32>
    %12 = vector.shape_cast %9 : vector<8x1xf32> to vector<1x8x1xf32>
    tpu.vector_store %arg5[%c0_8, %c0_9, %c0_10], %12 {strides = array<i32>} : memref<1x8x1xf32, #tpu.memory_space<vmem>>, vector<1x8x1xf32>,
    %13 = arith.mulf %3, %3 : vector<8x512xf32>
    %cst_11 = arith.constant dense<0.000000e+00> : vector<8xf32>
    %14 = vector.multi_reduction <add>, %13, %cst_11 [1] : vector<8x512xf32> to vector<8xf32>
    %15 = vector.shape_cast %14 : vector<8xf32> to vector<8x1xf32>
    %c0_12 = arith.constant 0 : index
    %c0_13 = arith.constant 0 : index
    %c0_14 = arith.constant 0 : index
    %16 = vector.load %arg6[%c0_12, %c0_13, %c0_14] : memref<1x8x1xf32, #tpu.memory_space<vmem>>, vector<1x8x1xf32>
    %17 = vector.shape_cast %16 : vector<1x8x1xf32> to vector<8x1xf32>
    %18 = vector.shape_cast %15 : vector<8x1xf32> to vector<1x8x1xf32>
    tpu.vector_store %arg6[%c0_12, %c0_13, %c0_14], %18 {strides = array<i32>} : memref<1x8x1xf32, #tpu.memory_space<vmem>>, vector<1x8x1xf32>,
    return
  }
  func.func @transform_0(%arg0: i32, %arg1: i32) -> (i32, i32, i32) {
    %c0_i32 = arith.constant 0 : i32
    %c0_i32_0 = arith.constant 0 : i32
    return %arg0, %c0_i32, %arg1 : i32, i32, i32
  }
  func.func @transform_1(%arg0: i32, %arg1: i32) -> (i32, i32) {
    %c0_i32 = arith.constant 0 : i32
    %c0_i32_0 = arith.constant 0 : i32
    %c0_i32_1 = arith.constant 0 : i32
    return %c0_i32, %c0_i32_0 : i32, i32
  }
  func.func @transform_2(%arg0: i32, %arg1: i32) -> (i32, i32, i32) {
    %c0_i32 = arith.constant 0 : i32
    %c0_i32_0 = arith.constant 0 : i32
    return %arg0, %c0_i32, %arg1 : i32, i32, i32
  }
  func.func @transform_3(%arg0: i32, %arg1: i32) -> (i32, i32, i32) {
    %c1_i32 = arith.constant 1 : i32
    %0 = arith.muli %arg0, %c1_i32 : i32
    %1 = arith.addi %0, %arg1 : i32
    %c0_i32 = arith.constant 0 : i32
    %c0_i32_0 = arith.constant 0 : i32
    %c0_i32_1 = arith.constant 0 : i32
    return %1, %c0_i32, %c0_i32_0 : i32, i32, i32
  }
  func.func @transform_4(%arg0: i32, %arg1: i32) -> (i32, i32, i32) {
    %c1_i32 = arith.constant 1 : i32
    %0 = arith.muli %arg0, %c1_i32 : i32
    %1 = arith.addi %0, %arg1 : i32
    %c0_i32 = arith.constant 0 : i32
    %c0_i32_0 = arith.constant 0 : i32
    %c0_i32_1 = arith.constant 0 : i32
    return %1, %c0_i32, %c0_i32_0 : i32, i32, i32
  }
}

</mosaic_0001>

<bundles_post_ra>
// kernel: tpu_custom_call.1
= control target key start
LH: loop header
LB: loop body
LE: loop exit
PB: predicated region body
PF: predicated region fallthrough
CT: control target
= control target key end

     0   :  { %s1328_s0 = inlined_call_operand.hbm [shape: bf16[2,128,512], index: 0, kind: input, shape index: {}]   ;;  %s1329_s1 = inlined_call_operand.hbm [shape: bf16[8,128], index: 1, kind: input, shape index: {}]   ;;  %s1330_s2 = inlined_call_operand.hbm [shape: bf16[2,8,512], index: 2, kind: output, shape index: {0}]   ;;  %s1331_s3 = inlined_call_operand.vmem [shape: f32[2,8,1], index: 3, kind: output, shape index: {1}]   ;;  %s1332_s4 = inlined_call_operand.vmem [shape: f32[2,8,1], index: 4, kind: output, shape index: {2}]  }
   0x1   :  { %1336 = sst [smem:[#allocation12_spill]] %s1329_s1 }
   0x2   :  { %10 = vsyncpa [#allocation3], 0 }
   0x3   :  { %12 = vsyncpa [#allocation3 + $0x1], 0 }
   0x4   :  { %13 = vsyncpa [#allocation6], 0 }
   0x5   :  { %14 = vsyncpa [#allocation4], 0 }
   0x6   :  { %16 = vsyncpa [#allocation4 + $0x1], 0  ;;  %s1122_s15 = smov 0   ;;  %s1124_s16 = smov 0  }
   0x7   :  { %s1126_s17 = smov 0   ;;  %s1128_s18 = smov 0  }
   0x8   :  { %s1130_s19 = smov 0   ;;  %s1132_s20 = smov 0  }
   0x9 LB: > { %s770_s21 = sadd.s32 4294967295, %s1089_s20   ;;  %s771_s22 = sadd.s32 4294967294, %s1089_s20   ;;  %s1089_s20 = sphi %s1132_s20, %s22_s20   ;;  %s1085_s19 = sphi %s1130_s19, %s1356_s19   ;;  %s1081_s18 = sphi %s1128_s18, %s1355_s18   ;;  %s1077_s17 = sphi %s1126_s17, %s1354_s17   ;;  %s1073_s16 = sphi %s1124_s16, %s1353_s16   ;;  %s1069_s15 = sphi %s1122_s15, %s1352_s15  }
   0xa   : > { %s43_s23 = sadd.s32 1, %s1077_s17  ;;  %p50_p0 = scmp.ne.s32.totalorder %s1077_s17, %s1073_s16 }
   0xb   : > { %p51_p1 = scmp.eq.s32.totalorder %s1089_s20, 0  ;;  %p56_p2 = scmp.ne.s32.totalorder %s1073_s16, %s1069_s15 }
   0xc   : > { %p1160_p3 = scmp.eq.s32.totalorder %s770_s21, 0  ;;  %p103_p4 = scmp.eq.s32.totalorder %s770_s21, 1 }
   0xd   : > { %p1164_p5 = por %p51_p1, %p50_p0  ;;  %p109_p6 = scmp.eq.s32.totalorder %s771_s22, 1 }
   0xe   : > { %p1170_p7 = por %p1160_p3, %p56_p2  ;;  %p1174_p8 = por %p103_p4, %p50_p0 }
   0xf   : > { %p1178_p9 = por %p109_p6, %p56_p2  ;;  %p772_p10 = scmp.ge.s32.totalorder %s1089_s20, 1 }
  0x10   : > { %s1339_s26 = scalar_select %p1170_p7, 1, 0 }
  0x11   : > { %s1340_s27 = scalar_select %p1174_p8, 1, 0 }
  0x12   : > { %s1341_s28 = scalar_select %p1178_p9, 1, 0 }
  0x13   : > { %p172_p11 = scmp.lt.s32.totalorder %s1089_s20, 3  ;;  %s1091_s30 = smov [#allocation5]  }
  0x14   : > { %s185_s5 = sshll.u32 %s1091_s30, 4  ;;  %p848_p1 = scmp.lt.s32.totalorder %s1089_s20, 2  ;;  %s186_s5 = int_to_ptr.vmem [resolvable:$true] %s185_s5 }
  0x15   : > { %p1185_p13 = pnand %p772_p10, %p172_p11  ;;  %s34_s8 = sadd.s32 1, %s1085_s19 }
  0x16   : > { %p1194_p4 = pnand %p848_p1, %p1164_p5  ;;  %p36_p6 = scmp.ge.s32.totalorder %s34_s8, 2 }
  0x17   : > { %p835_p0 = pneg %p1185_p13  ;;  %s196_s9 = sand.u32 1, %s1077_s17  }
  0x18   : > { %s962_s10 = scalar_lea.vmem %s186_s5, 64  ;;  %p970_p8 = scmp.lt.s32.totalorder %s186_s5, %s186_s5 }
  0x19   : > { %p1200_p2 = pnand %p835_p0, %p1160_p3  ;;  %p963_p11 = scmp.ne.s32.totalorder %s186_s5, %s962_s10 }
  0x1a   : > { %p971_p5 = scmp.lt.s32.totalorder %s962_s10, %s962_s10 }
  0x1b   : > { %p953_p10 = pneg %p1200_p2 }
  0x1c   : > { %p972_p1 = por %p971_p5, %p970_p8 }
  0x1d   : > { %p965_p12 = pnand %p963_p11, %p953_p10 }
  0x1f   : > { %p966_p9 = pneg %p965_p12 }
  0x21   : > { %p973_p7 = pnand %p972_p1, %p966_p9 }
  0x23   : > { %976 = shalt.err (!%p973_p7)
}
  0x24   : > { %s1345_s1 = sld [smem:[#allocation12_spill]]  ;;  %s1358_s8 = smov (%p36_p6, %s34_s8), 0 }
  0x25   : > { %1346 = sst [smem:[#allocation11_spill]] %s1358_s8  ;;  %s775_s13 = sshll.u32 %s196_s9, 8 }
  0x26   : > { %s38_s14 = ssub.s32 %s1085_s19, %s1358_s8  ;;  %s823_s21 = sshll.u32 %s1085_s19, 12 }
  0x27   : > { %p41_p12 = scmp.eq.s32.totalorder %s38_s14, 0  ;;  %s208_s30 = scalar_lea.hbm %s1328_s0, %s823_s21 }
  0x28   : > { %s200_s7 = scalar_lea.vmem [#allocation2], %s775_s13  ;;  %s197_s12 = scalar_lea.sflag [#allocation3], %s196_s9 }
  0x29   : > { %s209_s10 = sshll.u32 %s200_s7, 4  ;;  %p979_p7 = pneg %p1194_p4  ;;  %s210_s10 = int_to_ptr.vmem [resolvable:$true] %s209_s10 }
  0x2a   : > { %838 = dma.hbm_to_vmem [thread:$0]  (!%p1200_p2), %s1345_s1, 64, %s186_s5, [#allocation6]  }
  0x2b   : > { %s1224_s11 = scalar_select %p41_p12, %s1077_s17, %s43_s23  }
  0x2c   : > { %s990_s5 = scalar_lea.vmem %s210_s10, 4096  ;;  %s1092_s1 = smov [#allocation2]  }
  0x2d   : > { %p991_p8 = scmp.ne.s32.totalorder %s210_s10, %s990_s5  ;;  %s995_s14 = sshll.u32 %s1092_s1, 4  ;;  %s996_s14 = int_to_ptr.vmem [resolvable:$false] %s995_s14 }
  0x2e   : > { %s997_s8 = scalar_lea.vmem %s996_s14, 8192  ;;  %p998_p2 = scmp.lt.s32.totalorder %s210_s10, %s996_s14 }
  0x2f   : > { %p993_p9 = pnand %p991_p8, %p979_p7  ;;  %p999_p6 = scmp.lt.s32.totalorder %s997_s8, %s990_s5 }
  0x31   : > { %p994_p0 = pneg %p993_p9  ;;  %p1000_p10 = por %p999_p6, %p998_p2 }
  0x33   : > { %p1001_p11 = pnand %p1000_p10, %p994_p0 }
  0x35   : > { %1004 = shalt.err (!%p1001_p11)
}
  0x36   : > { %s1093_s13 = smov 256   ;;  %s1094_s23 = smov 16  }
  0x37   : > { %842 = dma.hbm_to_vmem [thread:$0]  (!%p1194_p4), %s208_s30, 4096, %s210_s10, %s197_s12, %s1093_s13, %s1093_s13, %s1094_s23  }
  0x38   : > { %221 = sbr.rel (%p1185_p13) target bundleno = 442 (0x1ba), region = 28  ;;  %s1233_s9 = sand.u32 (!%p1185_p13), 1, %s1073_s16  }
  0x39   : > { %s779_s1 = sshll.u32 (!%p1185_p13), %s1233_s9, 8  ;;  %s224_s21 = scalar_lea.sflag (!%p1185_p13), [#allocation3], %s1233_s9 }
  0x3a   : > { %s1237_s8 = scalar_lea.vmem (!%p1185_p13), [#allocation2], %s779_s1  ;;  %p1347_p5 = scmp.ne.s32.totalorder (!%p1185_p13), %s1339_s26, 0 }
  0x3d   : > { %1056 = dma.done.wait (%p1347_p5), %s224_s21, 4096  }
  0x3e   : > { %1058 = vsyncadd (%p1347_p5), %s224_s21, 4294963200 }
  0x3f   : > { %1060 = dma.done.wait (%p1160_p3), [#allocation6], 64  }
  0x40   : > { %1062 = vsyncadd (%p1160_p3), [#allocation6], 4294967232  ;;  %v1095_v0 = vmov 0   ;;  %v903_v1 = vld [vmem:[%s1237_s8 + $0xe4] ss:$16 sps:$4 sm:$0xff]   ;;  %s781_s24 = sshll.u32 %s1233_s9, 4 }
  0x41   : > { %506 = vmatprep.mubr.bf16.mxu0 %v1095_v0  ;;  %547 = vmatprep.mubr.bf16.mxu1 %v1095_v0  ;;  %v905_v2 = vld [vmem:[%s1237_s8 + $0xec] ss:$16 sps:$4 sm:$0xff]   ;;  %v907_v3 = vld [vmem:[%s1237_s8 + $0xe0] ss:$16 sps:$4 sm:$0xff]   ;;  %v908_v4 = vld [vmem:[%s1237_s8 + $0xe8] ss:$16 sps:$4 sm:$0xff]  }
  0x42   : > { %474 = vmatprep.subr.bf16.mxu0 %v903_v1  ;;  %515 = vmatprep.subr.bf16.mxu1 %v905_v2  ;;  %v909_v5 = vld [vmem:[%s1237_s8 + $0xc4] ss:$16 sps:$4 sm:$0xff]   ;;  %v911_v6 = vld [vmem:[%s1237_s8 + $0xcc] ss:$16 sps:$4 sm:$0xff]   ;;  %v913_v7 = vld [vmem:[%s1237_s8 + $0xc0] ss:$16 sps:$4 sm:$0xff]  }
  0x43   : > { %475 = vmatpush1.bf16.msra.mxu0 %v907_v3  ;;  %516 = vmatpush1.bf16.msra.mxu1 %v908_v4  ;;  %v914_v8 = vld [vmem:[%s1237_s8 + $0xc8] ss:$16 sps:$4 sm:$0xff]   ;;  %v915_v9 = vld [vmem:[%s1237_s8 + $0xa4] ss:$16 sps:$4 sm:$0xff]   ;;  %v917_v10 = vld [vmem:[%s1237_s8 + $0xac] ss:$16 sps:$4 sm:$0xff]  }
  0x44   : > { %476 = vmatprep.subr.bf16.mxu0 %v909_v5  ;;  %517 = vmatprep.subr.bf16.mxu1 %v911_v6  ;;  %v919_v11 = vld [vmem:[%s1237_s8 + $0xa0] ss:$16 sps:$4 sm:$0xff]   ;;  %v920_v12 = vld [vmem:[%s1237_s8 + $0xa8] ss:$16 sps:$4 sm:$0xff]   ;;  %v921_v13 = vld [vmem:[%s1237_s8 + $0x84] ss:$16 sps:$4 sm:$0xff]  }
  0x45   : > { %v923_v14 = vld [vmem:[%s1237_s8 + $0x8c] ss:$16 sps:$4 sm:$0xff]   ;;  %v925_v15 = vld [vmem:[%s1237_s8 + $0x80] ss:$16 sps:$4 sm:$0xff]   ;;  %v926_v16 = vld [vmem:[%s1237_s8 + $0x88] ss:$16 sps:$4 sm:$0xff]  }
  0x46   : > { %v927_v17 = vld [vmem:[%s1237_s8 + $0x64] ss:$16 sps:$4 sm:$0xff]   ;;  %v929_v18 = vld [vmem:[%s1237_s8 + $0x6c] ss:$16 sps:$4 sm:$0xff]   ;;  %v931_v19 = vld [vmem:[%s1237_s8 + $0x60] ss:$16 sps:$4 sm:$0xff]  }
  0x47   : > { %477 = vmatpush1.bf16.msra.mxu0 %v913_v7  ;;  %518 = vmatpush1.bf16.msra.mxu1 %v914_v8  ;;  %v932_v20 = vld [vmem:[%s1237_s8 + $0x68] ss:$16 sps:$4 sm:$0xff]   ;;  %v933_v21 = vld [vmem:[%s1237_s8 + $0x44] ss:$16 sps:$4 sm:$0xff]   ;;  %v935_v22 = vld [vmem:[%s1237_s8 + $0x4c] ss:$16 sps:$4 sm:$0xff]  }
  0x48   : > { %478 = vmatprep.subr.bf16.mxu0 %v915_v9  ;;  %519 = vmatprep.subr.bf16.mxu1 %v917_v10  ;;  %v937_v23 = vld [vmem:[%s1237_s8 + $0x40] ss:$16 sps:$4 sm:$0xff]   ;;  %v938_v24 = vld [vmem:[%s1237_s8 + $0x48] ss:$16 sps:$4 sm:$0xff]   ;;  %v939_v25 = vld [vmem:[%s1237_s8 + $0x24] ss:$16 sps:$4 sm:$0xff]  }
  0x49   : > { %v941_v26 = vld [vmem:[%s1237_s8 + $0x2c] ss:$16 sps:$4 sm:$0xff]   ;;  %v943_v27 = vld [vmem:[%s1237_s8 + $0x20] ss:$16 sps:$4 sm:$0xff]   ;;  %v944_v28 = vld [vmem:[%s1237_s8 + $0x28] ss:$16 sps:$4 sm:$0xff]  }
  0x4a   : > { %v945_v29 = vld [vmem:[%s1237_s8 + $0x4] ss:$16 sps:$4 sm:$0xff]   ;;  %v947_v30 = vld [vmem:[%s1237_s8 + $0xc] ss:$16 sps:$4 sm:$0xff]   ;;  %v949_v31 = vld [vmem:[%s1237_s8] ss:$16 sps:$4 sm:$0xff]  }
  0x4b   : > { %479 = vmatpush1.bf16.msra.mxu0 %v919_v11  ;;  %520 = vmatpush1.bf16.msra.mxu1 %v920_v12  ;;  %v950_v32 = vld [vmem:[%s1237_s8 + $0x8] ss:$16 sps:$4 sm:$0xff]   ;;  %v281_v33 = vld [vmem:[#allocation5] sm:$0xf]  ;;  %s251_s26 = scalar_lea.vmem [#allocation7], %s781_s24  ;;  %s826_s29 = sshll.u32 %s1081_s18, 8 }
  0x4c   : > { %480 = vmatprep.subr.bf16.mxu0 %v921_v13  ;;  %521 = vmatprep.subr.bf16.mxu1 %v923_v14  ;;  %s618_s6 = sshll.u32 %s251_s26, 4  ;;  %s616_s30 = scalar_lea.hbm %s1330_s2, %s826_s29  ;;  %s619_s6 = int_to_ptr.vmem [resolvable:$true] %s618_s6 }
  0x4d   : > { %s592_s7 = scalar_lea.sflag [#allocation4], %s1233_s9  ;;  %s1005_s10 = scalar_lea.vmem %s619_s6, 256 }
  0x4e   : > { %p1006_p3 = scmp.ne.s32.totalorder %s619_s6, %s1005_s10  ;;  %p1348_p13 = scmp.ne.s32.totalorder %s1340_s27, 0 }
  0x4f   : > { %481 = vmatpush1.bf16.msra.mxu0 %v925_v15  ;;  %522 = vmatpush1.bf16.msra.mxu1 %v926_v16  ;;  %s1096_s12 = smov [#allocation7]  }
  0x50   : > { %482 = vmatprep.subr.bf16.mxu0 %v927_v17  ;;  %523 = vmatprep.subr.bf16.mxu1 %v929_v18  ;;  %p1007_p4 = pnand %p1006_p3, %p1348_p13  ;;  %s1009_s5 = sshll.u32 %s1096_s12, 4  ;;  %s1010_s5 = int_to_ptr.vmem [resolvable:$false] %s1009_s5 }
  0x51   : > { %s1011_s14 = scalar_lea.vmem %s1010_s5, 512  ;;  %p1012_p12 = scmp.lt.s32.totalorder %s619_s6, %s1010_s5 }
  0x52   : > { %p1008_p1 = pneg %p1007_p4  ;;  %p1013_p7 = scmp.lt.s32.totalorder %s1011_s14, %s1005_s10 }
  0x53   : > { %483 = vmatpush1.bf16.msra.mxu0 %v931_v19  ;;  %524 = vmatpush1.bf16.msra.mxu1 %v932_v20 }
  0x54   : > { %484 = vmatprep.subr.bf16.mxu0 %v933_v21  ;;  %525 = vmatprep.subr.bf16.mxu1 %v935_v22  ;;  %p1014_p8 = por %p1013_p7, %p1012_p12 }
  0x56   : > { %p1015_p9 = pnand %p1014_p8, %p1008_p1 }
  0x57   : > { %485 = vmatpush1.bf16.msra.mxu0 %v937_v23  ;;  %526 = vmatpush1.bf16.msra.mxu1 %v938_v24 }
  0x58   : > { %486 = vmatprep.subr.bf16.mxu0 %v939_v25  ;;  %527 = vmatprep.subr.bf16.mxu1 %v941_v26 }
  0x5b   : > { %487 = vmatpush1.bf16.msra.mxu0 %v943_v27  ;;  %528 = vmatpush1.bf16.msra.mxu1 %v944_v28 }
  0x5c   : > { %488 = vmatprep.subr.bf16.mxu0 %v945_v29  ;;  %529 = vmatprep.subr.bf16.mxu1 %v947_v30 }
  0x5f   : > { %489 = vmatpush1.bf16.msra.mxu0 %v949_v31  ;;  %530 = vmatpush1.bf16.msra.mxu1 %v950_v32 }
  0x62   : > { %507 = vmatmul.mubr.bf16.vlgmr.msra.gmra.mxu0 %v281_v33  ;;  %548 = vmatmul.mubr.bf16.vlgmr.msra.gmra.mxu1 %v281_v33 }
 0x122   : > { %v508_v34 = vpop.f32.mrf.mxu0  ;;  %v549_v35 = vpop.f32.mrf.mxu1 }
 0x123   : > { %v581_v36 = vmul.f32 %v508_v34, %v508_v34  ;;  %v583_v37 = vmul.f32 %v549_v35, %v549_v35 }
 0x124   : > { %v510_v38 = vpop.f32.mrf.mxu0  ;;  %v551_v39 = vpop.f32.mrf.mxu1 }
 0x125   : > { %v824_v40 = vpack.c.bf16 %v510_v38, %v508_v34  ;;  %v574_v41 = vadd.f32 %v510_v38, %v508_v34  ;;  %v582_v42 = vmul.f32 %v510_v38, %v510_v38  ;;  %v825_v43 = vpack.c.bf16 %v551_v39, %v549_v35 }
 0x126   : > { %v512_v44 = vpop.f32.mrf.mxu0  ;;  %v553_v45 = vpop.f32.mrf.mxu1  ;;  %v584_v52 = vmul.f32 %v551_v39, %v551_v39 }
 0x127   : > { %572 = vst [vmem:[%s251_s26] sm:$0xff] %v824_v40  ;;  %573 = vst [vmem:[%s251_s26 + $0x8] sm:$0xff] %v825_v43  ;;  %v575_v46 = vadd.f32 %v574_v41, %v549_v35  ;;  %v585_v47 = vadd.f32 %v582_v42, %v581_v36 }
 0x128   : > { %v513_v48 = vpop.f32.mrf.mxu0  ;;  %v554_v49 = vpop.f32.mrf.mxu1 }
 0x129   : > { %v576_v50 = vadd.f32 %v575_v46, %v551_v39  ;;  %v586_v51 = vadd.f32 %v585_v47, %v583_v37 }
 0x12b   : > { %577 = vadd.xlane.f32.xlu0 %v576_v50  ;;  %v587_v53 = vadd.f32 %v586_v51, %v584_v52 }
 0x12f   : > { %588 = vadd.xlane.f32.xlu0 %v587_v53 }
 0x130   : > { %1018 = shalt.err (!%p1015_p9)
}
 0x131   : > { %s1019_s13 = scalar_lea.hbm %s616_s30, 256  ;;  %s1023_s1 = scalar_lea.hbm %s1330_s2, 512 }
 0x132   : > { %p1020_p0 = scmp.ne.s32.totalorder %s616_s30, %s1019_s13  ;;  %p1024_p10 = scmp.lt.s32.totalorder %s616_s30, %s1330_s2 }
 0x133   : > { %p1025_p11 = scmp.lt.s32.totalorder %s1023_s1, %s1019_s13 }
 0x134   : > { %p1021_p2 = pnand %p1020_p0, %p1348_p13 }
 0x135   : > { %p1026_p5 = por %p1025_p11, %p1024_p10 }
 0x136   : > { %p1022_p6 = pneg %p1021_p2 }
 0x138   : > { %p1027_p3 = pnand %p1026_p5, %p1022_p6 }
 0x13a   : > { %1030 = shalt.err (!%p1027_p3)
}
 0x13b   : > { %833 = dma.vmem_to_hbm [thread:$0]  (%p1348_p13), %s619_s6, 256, %s616_s30, %s592_s7   ;;  %vm579_vm0 = vcmask 7168  }
 0x13c   : > { %p269_p4 = scmp.lt.s32.totalorder %s1081_s18, 1 }
 0x13e   : > { %s1360_s18 = smov (!%p269_p4, %s1081_s18), 1 }
 0x13f   : > { %s782_s24 = sshll.u32 %s1360_s18, 3 }
 0x140   : > { %s272_s22 = scalar_lea.vmem %s1331_s3, %s782_s24  ;;  %s278_s12 = scalar_lea.vmem %s1332_s4, %s782_s24 }
 0x1b4   : > { %v578_v54 = vpop.xlane.xlu0 %577 }
 0x1b5   : > { %580 = vst.msk [vmem:[%s272_s22] sm:$0xff] %vm579_vm0, %v578_v54 }
 0x1b8   : > { %v589_v55 = vpop.xlane.xlu0 %588 }
 0x1b9   : > { %590 = vst.msk [vmem:[%s278_s12] sm:$0xff] %vm579_vm0, %v589_v55 }
 0x1ba PF: > { %s638_s27 = sand.u32 1, %s1069_s15   ;;  %p1349_p13 = scmp.ne.s32.totalorder %s1341_s28, 0 }
 0x1bb   : > { %p1350_p1 = scmp.ge.s32.totalorder %s1089_s20, 2  ;;  %s639_s18 = scalar_lea.sflag [#allocation4], %s638_s27 }
 0x1bd   : > { %p844_p12 = pnand %p1350_p1, %p1349_p13 }
 0x1bf   : > { %p845_p7 = pneg %p844_p12 }
 0x1c1   : > { %1064 = dma.done.wait (%p845_p7), %s639_s18, 256  }
 0x1c2   : > { %1066 = vsyncadd (%p845_p7), %s639_s18, 4294967040  ;;  %s22_s20 = sadd.s32 1, %s1089_s20   ;;  %s1351_s6 = sld [smem:[#allocation11_spill]] }
 0x1c3   : > { %p19_p8 = scmp.ge.s32.totalorder %s22_s20, 4   ;;  %s1352_s15 = smov %s1073_s16 }
 0x1c4   : > { %s1353_s16 = smov %s1077_s17  ;;  %s1354_s17 = smov %s1224_s11 }
 0x1c5   : > { %s1355_s18 = smov %s1085_s19  ;;  %21 = sbr.rel (!%p19_p8) target bundleno = 9 (0x9), region = 101 }
 0x1c8   : > { %s1356_s19 = smov %s1351_s6 }
 0x1ca   :  { %660 = vsyncpa [#allocation3], 1 }
 0x1cb   :  { %662 = vsyncpa [#allocation3 + $0x1], 1 }
 0x1cc   :  { %663 = vsyncpa [#allocation6], 1 }
 0x1cd   :  { %664 = vsyncpa [#allocation4], 1 }
 0x1ce   :  { %666 = vsyncpa [#allocation4 + $0x1], 1 }

</bundles_post_ra>
